<compile_context>
chip_gen: v6e
topology: v6e:2x2x1
jax: 0.10.0
libtpu: 0.0.40
codegen_flags: <defaults>
</compile_context>

<pallas_src>
import functools
import math

import jax
import jax.numpy as jnp
import numpy as np
from jax.experimental import pallas as pl
from jax.experimental.pallas import tpu as pltpu

# ---------------- small config consistent with SambaBlock ----------------
B = 2            # batch
T = 8            # sequence length
D = 32           # hidden_size
NUM_HEADS = 4
NUM_KV_HEADS = 2
HEAD_DIM = D // NUM_HEADS          # 8
WINDOW = 2048                      # sliding window (>= T -> plain causal)
NORM_EPS = 1e-5
HIDDEN_RATIO = 4
ROPE_THETA = 10000.0
LAYER_IDX = 1                      # odd -> Attention mixer

_inter = int(D * HIDDEN_RATIO * 2 / 3)
INTER = 256 * ((_inter + 256 - 1) // 256)     # SambaMLP intermediate_size -> 256

Q_DIM = NUM_HEADS * HEAD_DIM                  # 32
K_DIM = NUM_KV_HEADS * HEAD_DIM               # 16
V_DIM = NUM_KV_HEADS * HEAD_DIM               # 16
QKV_DIM = Q_DIM + K_DIM + V_DIM               # 64


# ============================ fused Pallas kernel ============================

def samba_block_kernel(x_ref, wqkv_ref, wqkvr_ref, cos_ref, sin_ref, bias_ref,
                       wo_ref, wgu_ref, wd_ref, o_ref,
                       *, num_heads, num_kv_heads, head_dim, inter, eps):
    # x_ref: [B*T, D] — all rows of all batches in one slab.
    x = x_ref[...].astype(jnp.float32)                         # [BT, D]

    # ---- mixer RMSNorm (gain folded into the QKV weights on the host) ----
    h = x * jax.lax.rsqrt(jnp.mean(x * x, axis=-1, keepdims=True) + eps)

    # ---- fused QKV + rotated-QKV projections (two independent MXU pushes) ----
    qkv = jnp.dot(h, wqkv_ref[...], preferred_element_type=jnp.float32)    # [BT, QKV]
    qkvr = jnp.dot(h, wqkvr_ref[...], preferred_element_type=jnp.float32)  # [BT, QKV]
    # RoPE: cos=1 / rot-weight=0 on the v columns, so v passes through untouched.
    qkv = qkv * cos_ref[...] + qkvr * sin_ref[...]

    q_dim = num_heads * head_dim
    k_dim = num_kv_heads * head_dim
    q_all = qkv[:, :q_dim]                                     # [BT, H*Dh] (scale folded in)
    k_all = qkv[:, q_dim:q_dim + k_dim]                        # [BT, Hkv*Dh]
    v_all = qkv[:, q_dim + k_dim:]                             # [BT, Hkv*Dh]

    # ---- GQA sliding-window causal attention, o_proj folded into the head loop ----
    bias = bias_ref[...]                                       # [BT, BT] additive mask
    group = num_heads // num_kv_heads
    attn_out = None
    for kvh in range(num_kv_heads):
        k_h = k_all[:, kvh * head_dim:(kvh + 1) * head_dim]    # [BT, Dh]
        v_h = v_all[:, kvh * head_dim:(kvh + 1) * head_dim]    # [BT, Dh]
        for g in range(group):
            hq = kvh * group + g
            q_h = q_all[:, hq * head_dim:(hq + 1) * head_dim]  # [BT, Dh]
            s = jax.lax.dot_general(
                q_h, k_h, dimension_numbers=(((1,), (1,)), ((), ())),
                preferred_element_type=jnp.float32) + bias     # [BT, BT]
            m = jnp.max(s, axis=-1, keepdims=True)
            p = jnp.exp(s - m)
            p = p / jnp.sum(p, axis=-1, keepdims=True)         # exact denom (cheap here)
            hv = jnp.dot(p, v_h, preferred_element_type=jnp.float32)            # [BT, Dh]
            contrib = jnp.dot(hv, wo_ref[hq * head_dim:(hq + 1) * head_dim, :],
                              preferred_element_type=jnp.float32)               # [BT, D]
            attn_out = contrib if attn_out is None else attn_out + contrib

    # ---- mlp_norm (prenorm=True): residual <- attn_out + x; h2 = RMSNorm(residual) ----
    residual = attn_out + x
    h2 = residual * jax.lax.rsqrt(
        jnp.mean(residual * residual, axis=-1, keepdims=True) + eps)
    # (mlp_norm gain is folded into the fused gate/up weight)

    # ---- SwiGLU MLP: one fused gate/up matmul, split at a 128-aligned column ----
    gu = jnp.dot(h2, wgu_ref[...], preferred_element_type=jnp.float32)   # [BT, 2*INTER]
    gate = gu[:, :inter]
    up = gu[:, inter:]
    hmid = gate * jax.nn.sigmoid(gate) * up
    mlp = jnp.dot(hmid, wd_ref[...], preferred_element_type=jnp.float32)  # [BT, D]

    o_ref[...] = (residual + mlp).astype(o_ref.dtype)


# ============================ host-side prep / wrapper ============================

def build_rope_tables(batch, seq_len, num_heads, num_kv_heads, head_dim, theta):
    half = head_dim // 2
    inv_freq = 1.0 / (theta ** (np.arange(0, head_dim, 2, dtype=np.float32) / head_dim))
    freqs = np.arange(seq_len, dtype=np.float32)[:, None] * inv_freq[None, :]   # [T, Dh/2]
    cos_h = np.concatenate([np.cos(freqs), np.cos(freqs)], axis=-1)             # [T, Dh]
    sin_h = np.concatenate([np.sin(freqs), np.sin(freqs)], axis=-1)
    n_rope = num_heads + num_kv_heads
    v_dim = num_kv_heads * head_dim
    cos_t = np.concatenate([np.tile(cos_h, (1, n_rope)),
                            np.ones((seq_len, v_dim), np.float32)], axis=-1)    # [T, QKV]
    sin_t = np.concatenate([np.tile(sin_h, (1, n_rope)),
                            np.zeros((seq_len, v_dim), np.float32)], axis=-1)
    cos_full = np.tile(cos_t, (batch, 1))                                       # [B*T, QKV]
    sin_full = np.tile(sin_t, (batch, 1))

    # rotate-half as a matmul: (x @ R)[j] == rotate_half(x)[j] per q/k head block,
    # zero on the v block (so the rotated projection contributes nothing to v).
    R_h = np.zeros((head_dim, head_dim), np.float32)
    for i in range(half):
        R_h[i + half, i] = -1.0    # out[i]      = -x[i + half]
        R_h[i, i + half] = 1.0     # out[i+half] =  x[i]
    qkv_dim = n_rope * head_dim + v_dim
    R = np.zeros((qkv_dim, qkv_dim), np.float32)
    for hh in range(n_rope):
        s = hh * head_dim
        R[s:s + head_dim, s:s + head_dim] = R_h
    return R, jnp.asarray(cos_full), jnp.asarray(sin_full)


def build_mask_bias(batch, seq_len, window):
    """Additive bias [B*T, B*T]: 0 where attention is allowed (same batch, causal,
    within sliding window), -1e30 elsewhere (including cross-batch)."""
    idx = np.arange(seq_len)
    allowed = (idx[None, :] <= idx[:, None]) & (idx[None, :] > idx[:, None] - window)
    block = np.where(allowed, 0.0, -1e30).astype(np.float32)
    bias = np.full((batch * seq_len, batch * seq_len), -1e30, np.float32)
    for b in range(batch):
        s = b * seq_len
        bias[s:s + seq_len, s:s + seq_len] = block
    return jnp.asarray(bias)


def prepare_params(raw, batch, seq_len):
    """Convert PyTorch-style [out, in] weights into the fused/folded kernel layout."""
    scale = 1.0 / math.sqrt(HEAD_DIM)

    w_qkv_t = jnp.concatenate(
        [raw["q_proj"], raw["k_proj"], raw["v_proj"]], axis=0).T          # [D, QKV]
    # fold mixer_norm gain (rows) and attention scale (Q columns) into the weight
    w_qkv_t = w_qkv_t * raw["mixer_norm_w"][:, None]
    col_scale = jnp.concatenate([jnp.full((Q_DIM,), scale, jnp.float32),
                                 jnp.ones((K_DIM + V_DIM,), jnp.float32)])
    w_qkv_t = w_qkv_t * col_scale[None, :]

    R, cos_full, sin_full = build_rope_tables(
        batch, seq_len, NUM_HEADS, NUM_KV_HEADS, HEAD_DIM, ROPE_THETA)
    w_qkv_rot_t = w_qkv_t @ jnp.asarray(R)                                # [D, QKV]

    # fold mlp_norm gain into the fused gate/up weight
    w_gu_t = raw["gate_proj"].T * raw["mlp_norm_w"][:, None]              # [D, 2*INTER]

    return {
        "w_qkv_t": w_qkv_t,                       # [D, QKV]
        "w_qkv_rot_t": w_qkv_rot_t,               # [D, QKV]
        "rope_cos": cos_full,                     # [B*T, QKV]
        "rope_sin": sin_full,                     # [B*T, QKV]
        "mask_bias": build_mask_bias(batch, seq_len, WINDOW),   # [B*T, B*T]
        "w_o_t": raw["o_proj"].T,                 # [H*Dh, D]
        "w_gu_t": w_gu_t,                         # [D, 2*INTER]
        "w_down_t": raw["down_proj"].T,           # [INTER, D]
    }


def samba_block_forward(kparams, hidden_states):
    Bq, Tq, Dq = hidden_states.shape
    x2d = hidden_states.reshape(Bq * Tq, Dq)      # free layout change on the host

    kernel = functools.partial(
        samba_block_kernel,
        num_heads=NUM_HEADS, num_kv_heads=NUM_KV_HEADS, head_dim=HEAD_DIM,
        inter=INTER, eps=NORM_EPS)

    order = ["w_qkv_t", "w_qkv_rot_t", "rope_cos", "rope_sin", "mask_bias",
             "w_o_t", "w_gu_t", "w_down_t"]
    weights = [kparams[name] for name in order]

    def full_spec(arr):
        nd = arr.ndim
        return pl.BlockSpec(arr.shape, lambda *_, _nd=nd: (0,) * _nd)

    # Single grid step: all B*T rows processed at once (no serial per-batch loop
    # on single-TC v5e/v6e). ~130 KB of resident f32 weights fits VMEM everywhere.
    out2d = pl.pallas_call(
        kernel,
        grid=(1,),
        in_specs=[full_spec(x2d)] + [full_spec(w) for w in weights],
        out_specs=full_spec(x2d),
        out_shape=jax.ShapeDtypeStruct((Bq * Tq, Dq), hidden_states.dtype),
        compiler_params=pltpu.CompilerParams(
            dimension_semantics=("arbitrary",)),
    )(x2d, *weights)
    return out2d.reshape(Bq, Tq, Dq)


# ============================ pure-JAX reference ============================

def apply_rope_ref(x, positions, theta=ROPE_THETA):
    Dh = x.shape[-1]
    inv_freq = 1.0 / (theta ** (jnp.arange(0, Dh, 2, dtype=jnp.float32) / Dh))
    freqs = positions[:, None].astype(jnp.float32) * inv_freq[None, :]
    cos = jnp.concatenate([jnp.cos(freqs), jnp.cos(freqs)], axis=-1)
    sin = jnp.concatenate([jnp.sin(freqs), jnp.sin(freqs)], axis=-1)
    x1, x2 = x[..., : Dh // 2], x[..., Dh // 2:]
    rot = jnp.concatenate([-x2, x1], axis=-1)
    return x * cos[None, None] + rot * sin[None, None]


def reference_forward(raw, hidden_states):
    x = hidden_states.astype(jnp.float32)
    residual = x

    def rms(t, w):
        var = jnp.mean(t * t, axis=-1, keepdims=True)
        return t * jax.lax.rsqrt(var + NORM_EPS) * w

    h = rms(x, raw["mixer_norm_w"])
    q = h @ raw["q_proj"].T
    k = h @ raw["k_proj"].T
    v = h @ raw["v_proj"].T
    q = q.reshape(B, T, NUM_HEADS, HEAD_DIM).transpose(0, 2, 1, 3)
    k = k.reshape(B, T, NUM_KV_HEADS, HEAD_DIM).transpose(0, 2, 1, 3)
    v = v.reshape(B, T, NUM_KV_HEADS, HEAD_DIM).transpose(0, 2, 1, 3)
    pos = jnp.arange(T)
    q = apply_rope_ref(q, pos)
    k = apply_rope_ref(k, pos)
    group = NUM_HEADS // NUM_KV_HEADS
    k = jnp.repeat(k, group, axis=1)
    v = jnp.repeat(v, group, axis=1)
    s = jnp.einsum("bhqd,bhkd->bhqk", q, k) / math.sqrt(HEAD_DIM)
    qi = jnp.arange(T)[:, None]
    kj = jnp.arange(T)[None, :]
    mask = (kj <= qi) & (kj > qi - WINDOW)
    s = jnp.where(mask, s, -1e30)
    p = jax.nn.softmax(s, axis=-1)
    o = jnp.einsum("bhqk,bhkd->bhqd", p, v)
    o = o.transpose(0, 2, 1, 3).reshape(B, T, D) @ raw["o_proj"].T

    residual = o + residual
    h = rms(residual, raw["mlp_norm_w"])
    y = h @ raw["gate_proj"].T
    gate, up = y[..., :INTER], y[..., INTER:]
    mlp = (gate * jax.nn.sigmoid(gate) * up) @ raw["down_proj"].T
    return residual + mlp


# ============================ main ============================

if __name__ == "__main__":
    key = jax.random.PRNGKey(0)
    ks = jax.random.split(key, 9)

    def init_w(k, shape, fan_in):
        return jax.random.normal(k, shape, jnp.float32) * (1.0 / math.sqrt(fan_in))

    raw_params = {
        "mixer_norm_w": 1.0 + 0.1 * jax.random.normal(ks[0], (D,), jnp.float32),
        "mlp_norm_w":   1.0 + 0.1 * jax.random.normal(ks[1], (D,), jnp.float32),
        "q_proj":  init_w(ks[2], (NUM_HEADS * HEAD_DIM, D), D),
        "k_proj":  init_w(ks[3], (NUM_KV_HEADS * HEAD_DIM, D), D),
        "v_proj":  init_w(ks[4], (NUM_KV_HEADS * HEAD_DIM, D), D),
        "o_proj":  init_w(ks[5], (D, NUM_HEADS * HEAD_DIM), NUM_HEADS * HEAD_DIM),
        "gate_proj": init_w(ks[6], (2 * INTER, D), D),
        "down_proj": init_w(ks[7], (D, INTER), INTER),
    }

    x = jax.random.normal(ks[8], (B, T, D), jnp.float32)

    kernel_params = prepare_params(raw_params, B, T)
    out = samba_block_forward(kernel_params, x)
    out = jax.block_until_ready(out)

    ref = reference_forward(raw_params, x)
    np.testing.assert_allclose(np.asarray(out), np.asarray(ref), rtol=1e-3, atol=1e-3)

    print("KERNEL_OK")
</pallas_src>

<mosaic_0001>
module attributes {stable_mosaic.version = 11 : i64} {
  func.func @samba_block_kernel(%arg0: i32, %arg1: memref<16x32xf32, #tpu.memory_space<vmem>>, %arg2: memref<32x64xf32, #tpu.memory_space<vmem>>, %arg3: memref<32x64xf32, #tpu.memory_space<vmem>>, %arg4: memref<16x64xf32, #tpu.memory_space<vmem>>, %arg5: memref<16x64xf32, #tpu.memory_space<vmem>>, %arg6: memref<16x16xf32, #tpu.memory_space<vmem>>, %arg7: memref<32x32xf32, #tpu.memory_space<vmem>>, %arg8: memref<32x512xf32, #tpu.memory_space<vmem>>, %arg9: memref<256x32xf32, #tpu.memory_space<vmem>>, %arg10: memref<16x32xf32, #tpu.memory_space<vmem>>) attributes {dimension_semantics = [#tpu.dimension_semantics<arbitrary>], iteration_bounds = array<i64: 1>, scalar_prefetch = 0 : i64, scratch_operands = 0 : i64, tpu.core_type = #tpu.core_type<tc>, window_params = [{pipeline_mode = #tpu.pipeline_mode<synchronous>, transform_indices = @transform_0, window_bounds = array<i64: 16, 32>}, {pipeline_mode = #tpu.pipeline_mode<synchronous>, transform_indices = @transform_1, window_bounds = array<i64: 32, 64>}, {pipeline_mode = #tpu.pipeline_mode<synchronous>, transform_indices = @transform_2, window_bounds = array<i64: 32, 64>}, {pipeline_mode = #tpu.pipeline_mode<synchronous>, transform_indices = @transform_3, window_bounds = array<i64: 16, 64>}, {pipeline_mode = #tpu.pipeline_mode<synchronous>, transform_indices = @transform_4, window_bounds = array<i64: 16, 64>}, {pipeline_mode = #tpu.pipeline_mode<synchronous>, transform_indices = @transform_5, window_bounds = array<i64: 16, 16>}, {pipeline_mode = #tpu.pipeline_mode<synchronous>, transform_indices = @transform_6, window_bounds = array<i64: 32, 32>}, {pipeline_mode = #tpu.pipeline_mode<synchronous>, transform_indices = @transform_7, window_bounds = array<i64: 32, 512>}, {pipeline_mode = #tpu.pipeline_mode<synchronous>, transform_indices = @transform_8, window_bounds = array<i64: 256, 32>}, {pipeline_mode = #tpu.pipeline_mode<synchronous>, transform_indices = @transform_9, window_bounds = array<i64: 16, 32>}]} {
    %c0 = arith.constant 0 : index
    %c0_0 = arith.constant 0 : index
    %0 = vector.load %arg1[%c0, %c0_0] : memref<16x32xf32, #tpu.memory_space<vmem>>, vector<16x32xf32>
    %1 = arith.mulf %0, %0 : vector<16x32xf32>
    %cst = arith.constant dense<0.000000e+00> : vector<16xf32>
    %2 = vector.multi_reduction <add>, %1, %cst [1] : vector<16x32xf32> to vector<16xf32>
    %3 = vector.shape_cast %2 : vector<16xf32> to vector<16x1xf32>
    %cst_1 = arith.constant 3.200000e+01 : f32
    %4 = vector.broadcast %cst_1 : f32 to vector<16x1xf32>
    %5 = arith.divf %3, %4 : vector<16x1xf32>
    %cst_2 = arith.constant 9.99999974E-6 : f32
    %6 = vector.broadcast %cst_2 : f32 to vector<16x1xf32>
    %7 = arith.addf %5, %6 : vector<16x1xf32>
    %8 = math.rsqrt %7 : vector<16x1xf32>
    %9 = vector.broadcast %8 : vector<16x1xf32> to vector<16x32xf32>
    %10 = arith.mulf %0, %9 : vector<16x32xf32>
    %c0_3 = arith.constant 0 : index
    %c0_4 = arith.constant 0 : index
    %11 = vector.load %arg2[%c0_3, %c0_4] : memref<32x64xf32, #tpu.memory_space<vmem>>, vector<32x64xf32>
    %cst_5 = arith.constant dense<0.000000e+00> : vector<16x64xf32>
    %12 = tpu.matmul %10, %11, %cst_5 {dimension_numbers = #tpu.dot_dimension_numbers<[1], [0], [0], [1], [0, 0, 1, 1], [], []>} : vector<16x32xf32>, vector<32x64xf32>, vector<16x64xf32> -> vector<16x64xf32>
    %c0_6 = arith.constant 0 : index
    %c0_7 = arith.constant 0 : index
    %13 = vector.load %arg3[%c0_6, %c0_7] : memref<32x64xf32, #tpu.memory_space<vmem>>, vector<32x64xf32>
    %cst_8 = arith.constant dense<0.000000e+00> : vector<16x64xf32>
    %14 = tpu.matmul %10, %13, %cst_8 {dimension_numbers = #tpu.dot_dimension_numbers<[1], [0], [0], [1], [0, 0, 1, 1], [], []>} : vector<16x32xf32>, vector<32x64xf32>, vector<16x64xf32> -> vector<16x64xf32>
    %c0_9 = arith.constant 0 : index
    %c0_10 = arith.constant 0 : index
    %15 = vector.load %arg4[%c0_9, %c0_10] : memref<16x64xf32, #tpu.memory_space<vmem>>, vector<16x64xf32>
    %16 = arith.mulf %12, %15 : vector<16x64xf32>
    %c0_11 = arith.constant 0 : index
    %c0_12 = arith.constant 0 : index
    %17 = vector.load %arg5[%c0_11, %c0_12] : memref<16x64xf32, #tpu.memory_space<vmem>>, vector<16x64xf32>
    %18 = arith.mulf %14, %17 : vector<16x64xf32>
    %19 = arith.addf %16, %18 : vector<16x64xf32>
    %20 = vector.extract_strided_slice %19 {offsets = [0, 0], sizes = [16, 32], strides = [1, 1]} : vector<16x64xf32> to vector<16x32xf32>
    %21 = vector.extract_strided_slice %19 {offsets = [0, 32], sizes = [16, 16], strides = [1, 1]} : vector<16x64xf32> to vector<16x16xf32>
    %22 = vector.extract_strided_slice %19 {offsets = [0, 48], sizes = [16, 16], strides = [1, 1]} : vector<16x64xf32> to vector<16x16xf32>
    %c0_13 = arith.constant 0 : index
    %c0_14 = arith.constant 0 : index
    %23 = vector.load %arg6[%c0_13, %c0_14] : memref<16x16xf32, #tpu.memory_space<vmem>>, vector<16x16xf32>
    %24 = vector.extract_strided_slice %21 {offsets = [0, 0], sizes = [16, 8], strides = [1, 1]} : vector<16x16xf32> to vector<16x8xf32>
    %25 = vector.extract_strided_slice %22 {offsets = [0, 0], sizes = [16, 8], strides = [1, 1]} : vector<16x16xf32> to vector<16x8xf32>
    %26 = vector.extract_strided_slice %20 {offsets = [0, 0], sizes = [16, 8], strides = [1, 1]} : vector<16x32xf32> to vector<16x8xf32>
    %cst_15 = arith.constant dense<0.000000e+00> : vector<16x16xf32>
    %27 = tpu.matmul %26, %24, %cst_15 {dimension_numbers = #tpu.dot_dimension_numbers<[1], [1], [0], [0], [0, 0, 1, 0], [], []>} : vector<16x8xf32>, vector<16x8xf32>, vector<16x16xf32> -> vector<16x16xf32>
    %28 = arith.addf %27, %23 : vector<16x16xf32>
    %cst_16 = arith.constant dense<0xFF800000> : vector<16xf32>
    %29 = vector.multi_reduction <maximumf>, %28, %cst_16 [1] : vector<16x16xf32> to vector<16xf32>
    %30 = vector.shape_cast %29 : vector<16xf32> to vector<16x1xf32>
    %31 = vector.broadcast %30 : vector<16x1xf32> to vector<16x16xf32>
    %32 = arith.subf %28, %31 : vector<16x16xf32>
    %33 = math.exp %32 : vector<16x16xf32>
    %cst_17 = arith.constant dense<0.000000e+00> : vector<16xf32>
    %34 = vector.multi_reduction <add>, %33, %cst_17 [1] : vector<16x16xf32> to vector<16xf32>
    %35 = vector.shape_cast %34 : vector<16xf32> to vector<16x1xf32>
    %36 = vector.broadcast %35 : vector<16x1xf32> to vector<16x16xf32>
    %37 = arith.divf %33, %36 : vector<16x16xf32>
    %cst_18 = arith.constant dense<0.000000e+00> : vector<16x8xf32>
    %38 = tpu.matmul %37, %25, %cst_18 {dimension_numbers = #tpu.dot_dimension_numbers<[1], [0], [0], [1], [0, 0, 1, 1], [], []>} : vector<16x16xf32>, vector<16x8xf32>, vector<16x8xf32> -> vector<16x8xf32>
    %c0_19 = arith.constant 0 : index
    %c0_20 = arith.constant 0 : index
    %39 = vector.load %arg7[%c0_19, %c0_20] : memref<32x32xf32, #tpu.memory_space<vmem>>, vector<8x32xf32>
    %cst_21 = arith.constant dense<0.000000e+00> : vector<16x32xf32>
    %40 = tpu.matmul %38, %39, %cst_21 {dimension_numbers = #tpu.dot_dimension_numbers<[1], [0], [0], [1], [0, 0, 1, 1], [], []>} : vector<16x8xf32>, vector<8x32xf32>, vector<16x32xf32> -> vector<16x32xf32>
    %41 = vector.extract_strided_slice %20 {offsets = [0, 8], sizes = [16, 8], strides = [1, 1]} : vector<16x32xf32> to vector<16x8xf32>
    %cst_22 = arith.constant dense<0.000000e+00> : vector<16x16xf32>
    %42 = tpu.matmul %41, %24, %cst_22 {dimension_numbers = #tpu.dot_dimension_numbers<[1], [1], [0], [0], [0, 0, 1, 0], [], []>} : vector<16x8xf32>, vector<16x8xf32>, vector<16x16xf32> -> vector<16x16xf32>
    %43 = arith.addf %42, %23 : vector<16x16xf32>
    %cst_23 = arith.constant dense<0xFF800000> : vector<16xf32>
    %44 = vector.multi_reduction <maximumf>, %43, %cst_23 [1] : vector<16x16xf32> to vector<16xf32>
    %45 = vector.shape_cast %44 : vector<16xf32> to vector<16x1xf32>
    %46 = vector.broadcast %45 : vector<16x1xf32> to vector<16x16xf32>
    %47 = arith.subf %43, %46 : vector<16x16xf32>
    %48 = math.exp %47 : vector<16x16xf32>
    %cst_24 = arith.constant dense<0.000000e+00> : vector<16xf32>
    %49 = vector.multi_reduction <add>, %48, %cst_24 [1] : vector<16x16xf32> to vector<16xf32>
    %50 = vector.shape_cast %49 : vector<16xf32> to vector<16x1xf32>
    %51 = vector.broadcast %50 : vector<16x1xf32> to vector<16x16xf32>
    %52 = arith.divf %48, %51 : vector<16x16xf32>
    %cst_25 = arith.constant dense<0.000000e+00> : vector<16x8xf32>
    %53 = tpu.matmul %52, %25, %cst_25 {dimension_numbers = #tpu.dot_dimension_numbers<[1], [0], [0], [1], [0, 0, 1, 1], [], []>} : vector<16x16xf32>, vector<16x8xf32>, vector<16x8xf32> -> vector<16x8xf32>
    %c8 = arith.constant 8 : index
    %c0_26 = arith.constant 0 : index
    %54 = vector.load %arg7[%c8, %c0_26] : memref<32x32xf32, #tpu.memory_space<vmem>>, vector<8x32xf32>
    %cst_27 = arith.constant dense<0.000000e+00> : vector<16x32xf32>
    %55 = tpu.matmul %53, %54, %cst_27 {dimension_numbers = #tpu.dot_dimension_numbers<[1], [0], [0], [1], [0, 0, 1, 1], [], []>} : vector<16x8xf32>, vector<8x32xf32>, vector<16x32xf32> -> vector<16x32xf32>
    %56 = arith.addf %40, %55 : vector<16x32xf32>
    %57 = vector.extract_strided_slice %21 {offsets = [0, 8], sizes = [16, 8], strides = [1, 1]} : vector<16x16xf32> to vector<16x8xf32>
    %58 = vector.extract_strided_slice %22 {offsets = [0, 8], sizes = [16, 8], strides = [1, 1]} : vector<16x16xf32> to vector<16x8xf32>
    %59 = vector.extract_strided_slice %20 {offsets = [0, 16], sizes = [16, 8], strides = [1, 1]} : vector<16x32xf32> to vector<16x8xf32>
    %cst_28 = arith.constant dense<0.000000e+00> : vector<16x16xf32>
    %60 = tpu.matmul %59, %57, %cst_28 {dimension_numbers = #tpu.dot_dimension_numbers<[1], [1], [0], [0], [0, 0, 1, 0], [], []>} : vector<16x8xf32>, vector<16x8xf32>, vector<16x16xf32> -> vector<16x16xf32>
    %61 = arith.addf %60, %23 : vector<16x16xf32>
    %cst_29 = arith.constant dense<0xFF800000> : vector<16xf32>
    %62 = vector.multi_reduction <maximumf>, %61, %cst_29 [1] : vector<16x16xf32> to vector<16xf32>
    %63 = vector.shape_cast %62 : vector<16xf32> to vector<16x1xf32>
    %64 = vector.broadcast %63 : vector<16x1xf32> to vector<16x16xf32>
    %65 = arith.subf %61, %64 : vector<16x16xf32>
    %66 = math.exp %65 : vector<16x16xf32>
    %cst_30 = arith.constant dense<0.000000e+00> : vector<16xf32>
    %67 = vector.multi_reduction <add>, %66, %cst_30 [1] : vector<16x16xf32> to vector<16xf32>
    %68 = vector.shape_cast %67 : vector<16xf32> to vector<16x1xf32>
    %69 = vector.broadcast %68 : vector<16x1xf32> to vector<16x16xf32>
    %70 = arith.divf %66, %69 : vector<16x16xf32>
    %cst_31 = arith.constant dense<0.000000e+00> : vector<16x8xf32>
    %71 = tpu.matmul %70, %58, %cst_31 {dimension_numbers = #tpu.dot_dimension_numbers<[1], [0], [0], [1], [0, 0, 1, 1], [], []>} : vector<16x16xf32>, vector<16x8xf32>, vector<16x8xf32> -> vector<16x8xf32>
    %c16 = arith.constant 16 : index
    %c0_32 = arith.constant 0 : index
    %72 = vector.load %arg7[%c16, %c0_32] : memref<32x32xf32, #tpu.memory_space<vmem>>, vector<8x32xf32>
    %cst_33 = arith.constant dense<0.000000e+00> : vector<16x32xf32>
    %73 = tpu.matmul %71, %72, %cst_33 {dimension_numbers = #tpu.dot_dimension_numbers<[1], [0], [0], [1], [0, 0, 1, 1], [], []>} : vector<16x8xf32>, vector<8x32xf32>, vector<16x32xf32> -> vector<16x32xf32>
    %74 = arith.addf %56, %73 : vector<16x32xf32>
    %75 = vector.extract_strided_slice %20 {offsets = [0, 24], sizes = [16, 8], strides = [1, 1]} : vector<16x32xf32> to vector<16x8xf32>
    %cst_34 = arith.constant dense<0.000000e+00> : vector<16x16xf32>
    %76 = tpu.matmul %75, %57, %cst_34 {dimension_numbers = #tpu.dot_dimension_numbers<[1], [1], [0], [0], [0, 0, 1, 0], [], []>} : vector<16x8xf32>, vector<16x8xf32>, vector<16x16xf32> -> vector<16x16xf32>
    %77 = arith.addf %76, %23 : vector<16x16xf32>
    %cst_35 = arith.constant dense<0xFF800000> : vector<16xf32>
    %78 = vector.multi_reduction <maximumf>, %77, %cst_35 [1] : vector<16x16xf32> to vector<16xf32>
    %79 = vector.shape_cast %78 : vector<16xf32> to vector<16x1xf32>
    %80 = vector.broadcast %79 : vector<16x1xf32> to vector<16x16xf32>
    %81 = arith.subf %77, %80 : vector<16x16xf32>
    %82 = math.exp %81 : vector<16x16xf32>
    %cst_36 = arith.constant dense<0.000000e+00> : vector<16xf32>
    %83 = vector.multi_reduction <add>, %82, %cst_36 [1] : vector<16x16xf32> to vector<16xf32>
    %84 = vector.shape_cast %83 : vector<16xf32> to vector<16x1xf32>
    %85 = vector.broadcast %84 : vector<16x1xf32> to vector<16x16xf32>
    %86 = arith.divf %82, %85 : vector<16x16xf32>
    %cst_37 = arith.constant dense<0.000000e+00> : vector<16x8xf32>
    %87 = tpu.matmul %86, %58, %cst_37 {dimension_numbers = #tpu.dot_dimension_numbers<[1], [0], [0], [1], [0, 0, 1, 1], [], []>} : vector<16x16xf32>, vector<16x8xf32>, vector<16x8xf32> -> vector<16x8xf32>
    %c24 = arith.constant 24 : index
    %c0_38 = arith.constant 0 : index
    %88 = vector.load %arg7[%c24, %c0_38] : memref<32x32xf32, #tpu.memory_space<vmem>>, vector<8x32xf32>
    %cst_39 = arith.constant dense<0.000000e+00> : vector<16x32xf32>
    %89 = tpu.matmul %87, %88, %cst_39 {dimension_numbers = #tpu.dot_dimension_numbers<[1], [0], [0], [1], [0, 0, 1, 1], [], []>} : vector<16x8xf32>, vector<8x32xf32>, vector<16x32xf32> -> vector<16x32xf32>
    %90 = arith.addf %74, %89 : vector<16x32xf32>
    %91 = arith.addf %90, %0 : vector<16x32xf32>
    %92 = arith.mulf %91, %91 : vector<16x32xf32>
    %cst_40 = arith.constant dense<0.000000e+00> : vector<16xf32>
    %93 = vector.multi_reduction <add>, %92, %cst_40 [1] : vector<16x32xf32> to vector<16xf32>
    %94 = vector.shape_cast %93 : vector<16xf32> to vector<16x1xf32>
    %cst_41 = arith.constant 3.200000e+01 : f32
    %95 = vector.broadcast %cst_41 : f32 to vector<16x1xf32>
    %96 = arith.divf %94, %95 : vector<16x1xf32>
    %cst_42 = arith.constant 9.99999974E-6 : f32
    %97 = vector.broadcast %cst_42 : f32 to vector<16x1xf32>
    %98 = arith.addf %96, %97 : vector<16x1xf32>
    %99 = math.rsqrt %98 : vector<16x1xf32>
    %100 = vector.broadcast %99 : vector<16x1xf32> to vector<16x32xf32>
    %101 = arith.mulf %91, %100 : vector<16x32xf32>
    %c0_43 = arith.constant 0 : index
    %c0_44 = arith.constant 0 : index
    %102 = vector.load %arg8[%c0_43, %c0_44] : memref<32x512xf32, #tpu.memory_space<vmem>>, vector<32x512xf32>
    %cst_45 = arith.constant dense<0.000000e+00> : vector<16x512xf32>
    %103 = tpu.matmul %101, %102, %cst_45 {dimension_numbers = #tpu.dot_dimension_numbers<[1], [0], [0], [1], [0, 0, 1, 1], [], []>} : vector<16x32xf32>, vector<32x512xf32>, vector<16x512xf32> -> vector<16x512xf32>
    %104 = vector.extract_strided_slice %103 {offsets = [0, 0], sizes = [16, 256], strides = [1, 1]} : vector<16x512xf32> to vector<16x256xf32>
    %105 = vector.extract_strided_slice %103 {offsets = [0, 256], sizes = [16, 256], strides = [1, 1]} : vector<16x512xf32> to vector<16x256xf32>
    %106 = arith.negf %104 : vector<16x256xf32>
    %107 = math.exp %106 : vector<16x256xf32>
    %cst_46 = arith.constant 1.000000e+00 : f32
    %108 = vector.broadcast %cst_46 : f32 to vector<16x256xf32>
    %109 = arith.addf %108, %107 : vector<16x256xf32>
    %110 = arith.divf %108, %109 : vector<16x256xf32>
    %111 = arith.mulf %104, %110 : vector<16x256xf32>
    %112 = arith.mulf %111, %105 : vector<16x256xf32>
    %c0_47 = arith.constant 0 : index
    %c0_48 = arith.constant 0 : index
    %113 = vector.load %arg9[%c0_47, %c0_48] : memref<256x32xf32, #tpu.memory_space<vmem>>, vector<256x32xf32>
    %cst_49 = arith.constant dense<0.000000e+00> : vector<16x32xf32>
    %114 = tpu.matmul %112, %113, %cst_49 {dimension_numbers = #tpu.dot_dimension_numbers<[1], [0], [0], [1], [0, 0, 1, 1], [], []>} : vector<16x256xf32>, vector<256x32xf32>, vector<16x32xf32> -> vector<16x32xf32>
    %115 = arith.addf %91, %114 : vector<16x32xf32>
    %c0_50 = arith.constant 0 : index
    %c0_51 = arith.constant 0 : index
    %116 = vector.load %arg10[%c0_50, %c0_51] : memref<16x32xf32, #tpu.memory_space<vmem>>, vector<16x32xf32>
    tpu.vector_store %arg10[%c0_50, %c0_51], %115 {strides = array<i32>} : memref<16x32xf32, #tpu.memory_space<vmem>>, vector<16x32xf32>,
    return
  }
  func.func @transform_0(%arg0: i32) -> (i32, i32) {
    %c0_i32 = arith.constant 0 : i32
    %c0_i32_0 = arith.constant 0 : i32
    %c0_i32_1 = arith.constant 0 : i32
    return %c0_i32, %c0_i32_0 : i32, i32
  }
  func.func @transform_1(%arg0: i32) -> (i32, i32) {
    %c0_i32 = arith.constant 0 : i32
    %c0_i32_0 = arith.constant 0 : i32
    %c0_i32_1 = arith.constant 0 : i32
    return %c0_i32, %c0_i32_0 : i32, i32
  }
  func.func @transform_2(%arg0: i32) -> (i32, i32) {
    %c0_i32 = arith.constant 0 : i32
    %c0_i32_0 = arith.constant 0 : i32
    %c0_i32_1 = arith.constant 0 : i32
    return %c0_i32, %c0_i32_0 : i32, i32
  }
  func.func @transform_3(%arg0: i32) -> (i32, i32) {
    %c0_i32 = arith.constant 0 : i32
    %c0_i32_0 = arith.constant 0 : i32
    %c0_i32_1 = arith.constant 0 : i32
    return %c0_i32, %c0_i32_0 : i32, i32
  }
  func.func @transform_4(%arg0: i32) -> (i32, i32) {
    %c0_i32 = arith.constant 0 : i32
    %c0_i32_0 = arith.constant 0 : i32
    %c0_i32_1 = arith.constant 0 : i32
    return %c0_i32, %c0_i32_0 : i32, i32
  }
  func.func @transform_5(%arg0: i32) -> (i32, i32) {
    %c0_i32 = arith.constant 0 : i32
    %c0_i32_0 = arith.constant 0 : i32
    %c0_i32_1 = arith.constant 0 : i32
    return %c0_i32, %c0_i32_0 : i32, i32
  }
  func.func @transform_6(%arg0: i32) -> (i32, i32) {
    %c0_i32 = arith.constant 0 : i32
    %c0_i32_0 = arith.constant 0 : i32
    %c0_i32_1 = arith.constant 0 : i32
    return %c0_i32, %c0_i32_0 : i32, i32
  }
  func.func @transform_7(%arg0: i32) -> (i32, i32) {
    %c0_i32 = arith.constant 0 : i32
    %c0_i32_0 = arith.constant 0 : i32
    %c0_i32_1 = arith.constant 0 : i32
    return %c0_i32, %c0_i32_0 : i32, i32
  }
  func.func @transform_8(%arg0: i32) -> (i32, i32) {
    %c0_i32 = arith.constant 0 : i32
    %c0_i32_0 = arith.constant 0 : i32
    %c0_i32_1 = arith.constant 0 : i32
    return %c0_i32, %c0_i32_0 : i32, i32
  }
  func.func @transform_9(%arg0: i32) -> (i32, i32) {
    %c0_i32 = arith.constant 0 : i32
    %c0_i32_0 = arith.constant 0 : i32
    %c0_i32_1 = arith.constant 0 : i32
    return %c0_i32, %c0_i32_0 : i32, i32
  }
}

</mosaic_0001>

<bundles_post_ra>
// kernel: tpu_custom_call.1
= control target key start
LH: loop header
LB: loop body
LE: loop exit
PB: predicated region body
PF: predicated region fallthrough
CT: control target
= control target key end

     0   :  { %vm37_vm0 = vcmask 261120   ;;  %s2411_s0 = inlined_call_operand.vmem [shape: f32[16,32], index: 0, kind: input, shape index: {}]   ;;  %s2412_s1 = inlined_call_operand.vmem [shape: f32[32,64], index: 1, kind: input, shape index: {}]   ;;  %s2413_s2 = inlined_call_operand.vmem [shape: f32[32,64], index: 2, kind: input, shape index: {}]   ;;  %s2414_s3 = inlined_call_operand.vmem [shape: f32[16,64], index: 3, kind: input, shape index: {}]   ;;  %s2415_s4 = inlined_call_operand.vmem [shape: f32[16,64], index: 4, kind: input, shape index: {}]   ;;  %s2416_s5 = inlined_call_operand.vmem [shape: f32[16,16], index: 5, kind: input, shape index: {}]   ;;  %s2417_s6 = inlined_call_operand.vmem [shape: f32[32,32], index: 6, kind: input, shape index: {}]   ;;  %s2418_s7 = inlined_call_operand.vmem [shape: f32[32,512], index: 7, kind: input, shape index: {}]   ;;  %s2419_s8 = inlined_call_operand.vmem [shape: f32[256,32], index: 8, kind: input, shape index: {}]   ;;  %s2420_s9 = inlined_call_operand.hbm [shape: f32[16,32], index: 9, kind: output, shape index: {}]  }
   0x1   :  { %v2075_v0 = vld [vmem:[%s2411_s0] sm:$0xff]  ;;  %v2080_v1 = vld [vmem:[%s2411_s0 + $0x8] sm:$0xff] }
   0x2   :  { %14 = vsyncpa [#allocation3], 0  ;;  %v35_v2 = vmul.f32 %v2075_v0, %v2075_v0  ;;  %v36_v3 = vmul.f32 %v2080_v1, %v2080_v1  ;;  %v56_v6 = vld [vmem:[%s2412_s1 + $0x18] sm:$0xff]  ;;  %v55_v7 = vld [vmem:[%s2412_s1 + $0x10] sm:$0xff]  ;;  %vm235_vm1 = vcmask 64512   ;;  %s2011_s13 = smov 96  }
   0x3   :  { %1824 = vmatprep.subr.mxu1 %v56_v6  ;;  %v54_v8 = vld [vmem:[%s2412_s1 + $0x8] sm:$0xff]  ;;  %v53_v9 = vld [vmem:[%s2412_s1] sm:$0xff]  ;;  %v141_v10 = vld [vmem:[%s2413_s2 + $0x18] sm:$0xff]  ;;  %vm319_vm2 = vcmask 130048   ;;  %s2012_s0 = smov 120   ;;  %s2013_s16 = smov 80  }
   0x4   :  { %v38_v4 = vsel %vm37_vm0, %v35_v2, 0.0  ;;  %v41_v5 = vsel %vm37_vm0, %v36_v3, 0.0  ;;  %1825 = vmatpush3.msra.mxu1 %v56_v6  ;;  %v140_v21 = vld [vmem:[%s2413_s2 + $0x10] sm:$0xff]  ;;  %v139_v22 = vld [vmem:[%s2413_s2 + $0x8] sm:$0xff]  ;;  %v138_v23 = vld [vmem:[%s2413_s2] sm:$0xff]  ;;  %s2014_s18 = smov 88  }
   0x5   :  { %39 = vadd.xlane.f32.xlu0 %v38_v4  ;;  %1826 = vmatprep.subr.mxu1 %v55_v7  ;;  %v218_v25 = vld [vmem:[%s2414_s3 + $0x8] sm:$0xff]  ;;  %v217_v28 = vld [vmem:[%s2414_s3] sm:$0xff]  ;;  %s2015_s19 = smov 112   ;;  %s2016_s20 = smov 104  }
   0x6   :  { %1827 = vmatpush3.msra.mxu1 %v55_v7  ;;  %v222_v27 = vld [vmem:[%s2415_s4 + $0x8] sm:$0xff]  ;;  %v221_v30 = vld [vmem:[%s2415_s4] sm:$0xff]  ;;  %s2017_s22 = smov 72  }
   0x7   :  { %1828 = vmatprep.subr.mxu1 %v54_v8  ;;  %v2147_v40 = vld [vmem:[%s2416_s5 + $0x8] sm:$0xff]  ;;  %v2152_v42 = vld [vmem:[%s2416_s5] sm:$0xff] }
   0x8   :  { %1829 = vmatpush3.msra.mxu1 %v54_v8  ;;  %v429_v6 = vld [vmem:[%s2417_s6] sm:$0xff] }
   0x9   :  { %42 = vadd.xlane.f32.xlu0 %v41_v5  ;;  %1830 = vmatprep.subr.mxu1 %v53_v9 }
   0xa   :  { %1831 = vmatpush3.msra.mxu1 %v53_v9 }
   0xb   :  { %1835 = vmatprep.subr.mxu1 %v141_v10 }
  0x8e   :  { %v40_v11 = vpop.xlane.xlu0 %39 }
  0x8f   :  { %v45_v12 = vmul.f32 0.03125, %v40_v11 }
  0x91   :  { %v47_v13 = vadd.f32 1e-05, %v45_v12 }
  0x92   :  { %v43_v14 = vpop.xlane.xlu0 %42 }
  0x93   :  { %1933 = vrsqrt.f32 %v47_v13  ;;  %v46_v15 = vmul.f32 0.03125, %v43_v14 }
  0x95   :  { %v48_v16 = vadd.f32 1e-05, %v46_v15 }
  0x97   :  { %1935 = vrsqrt.f32 %v48_v16 }
  0xa0   :  { %v1934_v17 = vpop.eup %1933 }
  0xa1   :  { %v51_v18 = vmul.f32 %v1934_v17, %v2075_v0 }
  0xa3   :  { %1832 = vmatprep.mubr.msk.f32.mxu1 %vm37_vm0, %v51_v18 }
  0xa4   :  { %v1936_v19 = vpop.eup %1935 }
  0xa5   :  { %v52_v20 = vmul.f32 %v1936_v19, %v2080_v1 }
  0xa7   :  { %1833 = vmatmul.mubr.msk.f32.vlgmr.msra.gmra.mxu1 %vm37_vm0, %v52_v20 }
  0xa8   :  { %1836 = vmatpush3.msra.mxu1 %v141_v10  ;;  %1843 = vmatprep.mubr.msk.f32.mxu1 %vm37_vm0, %v51_v18 }
  0xa9   :  { %1837 = vmatprep.subr.mxu1 %v140_v21 }
  0xaa   :  { %1838 = vmatpush3.msra.mxu1 %v140_v21 }
  0xab   :  { %1839 = vmatprep.subr.mxu1 %v139_v22 }
  0xac   :  { %1840 = vmatpush3.msra.mxu1 %v139_v22 }
  0xad   :  { %1841 = vmatprep.subr.mxu1 %v138_v23 }
  0xae   :  { %1842 = vmatpush3.msra.mxu1 %v138_v23 }
  0xaf   :  { %1844 = vmatmul.mubr.msk.f32.vlgmr.msra.gmra.mxu1 %vm37_vm0, %v52_v20 }
 0x167   :  { %v1834_v24 = vpop.f32.mrf.mxu1 }
 0x168   :  { %v220_v31 = vmul.f32 %v1834_v24, %v218_v25  ;;  %v616_v25 = vld [vmem:[%s2417_s6 + $0x8] sm:$0xff] }
 0x169   :  { %v129_v26 = vpop.f32.mrf.mxu1 }
 0x16a   :  { %v219_v34 = vmul.f32 %v217_v28, %v129_v26 }
 0x16f   :  { %v1845_v29 = vpop.f32.mrf.mxu1 }
 0x170   :  { %v224_v32 = vmul.f32 %v1845_v29, %v222_v27 }
 0x171   :  { %v208_v33 = vpop.f32.mrf.mxu1 }
 0x172   :  { %v2130_v35 = vadd.f32 %v224_v32, %v220_v31  ;;  %v223_v36 = vmul.f32 %v221_v30, %v208_v33 }
 0x174   :  { %v2132_v37 = vadd.f32 %v223_v36, %v219_v34  ;;  %233 = vrot.lane.b32.xlu1 %v2130_v35, %s2011_s13 }
 0x176   :  { %1850 = vmatprep.mubr.msk.f32.mxu1 %vm235_vm1, %v2132_v37 }
 0x178   :  { %231 = vrot.lane.b32.xlu1 %v2132_v37, %s2011_s13 }
 0x1e6   :  { %v234_v38 = vpop.permute.xlu1 %233 }
 0x1e7   :  { %1846 = vmatprep.subr.msk.mxu1 %vm235_vm1, %v234_v38 }
 0x1e8   :  { %1847 = vmatpush3.xpose.msk.msra.mxu1 %vm235_vm1, %v234_v38 }
 0x1ea   :  { %v232_v39 = vpop.permute.xlu1 %231 }
 0x1eb   :  { %1848 = vmatprep.subr.msk.mxu1 %vm235_vm1, %v232_v39 }
 0x1ec   :  { %1849 = vmatpush3.xpose.msk.msra.mxu1 %vm235_vm1, %v232_v39 }
 0x1ef   :  { %1851 = vmatmul.mubr.msk.f32.vlgmr.msra.gmra.mxu1 %vm235_vm1, %v2130_v35 }
 0x2af   :  { %v1852_v41 = vpop.f32.mrf.mxu1 }
 0x2b0   :  { %v316_v43 = vadd.f32 %v1852_v41, %v2147_v40 }
 0x2b1   :  { %v310_v44 = vpop.f32.mrf.mxu1 }
 0x2b2   :  { %v311_v45 = vadd.f32 %v310_v44, %v2152_v42  ;;  %v323_v46 = vsel %vm319_vm2, %v316_v43, -inf }
 0x2b3   :  { %324 = vmax.xlane.f32.xlu1 %v323_v46 }
 0x2b4   :  { %v320_v47 = vsel %vm319_vm2, %v311_v45, -inf }
 0x2b5   :  { %321 = vmax.xlane.f32.xlu0 %v320_v47 }
 0x2c4   :  { %430 = vrot.lane.b32.xlu1 %v2132_v37, %s2012_s0 }
 0x2cb   :  { %344 = vrot.lane.b32.xlu0 %v2130_v35, %s2013_s16 }
 0x33c   :  { %v325_v48 = vpop.xlane.xlu1 %324 }
 0x33d   :  { %v327_v49 = vsub.f32 %v316_v43, %v325_v48 }
 0x33e   :  { %v322_v50 = vpop.xlane.xlu0 %321 }
 0x33f   :  { %v330_v51 = vmul.f32 1.442695, %v327_v49  ;;  %v326_v52 = vsub.f32 %v311_v45, %v322_v50 }
 0x340   :  { %v431_v4 = vpop.permute.xlu1 %430 }
 0x341   :  { %1937 = vpow2.f32 %v330_v51  ;;  %v328_v53 = vmul.f32 1.442695, %v326_v52 }
 0x342   :  { %v345_v54 = vpop.permute.xlu0 %344 }
 0x343   :  { %1939 = vpow2.f32 %v328_v53  ;;  %1853 = vmatprep.subr.mxu1 %v345_v54  ;;  %1867 = vmatprep.subr.mxu0 %v345_v54 }
 0x344   :  { %1854 = vmatpush3.msra.mxu1 %v345_v54  ;;  %1868 = vmatpush3.msra.mxu0 %v345_v54 }
 0x34e   :  { %v1938_v55 = vpop.eup %1937 }
 0x34f   :  { %v335_v56 = vsel %vm319_vm2, %v1938_v55, 0.0 }
 0x350   :  { %v1940_v57 = vpop.eup %1939  ;;  %336 = vadd.xlane.f32.xlu0 %v335_v56 }
 0x351   :  { %v332_v58 = vsel %vm319_vm2, %v1940_v57, 0.0 }
 0x354   :  { %333 = vadd.xlane.f32.xlu0 %v332_v58 }
 0x36a   :  { %342 = vrot.lane.b32.xlu0 %v2132_v37, %s2013_s16 }
 0x36e   :  { %432 = vrot.lane.b32.xlu0 %v2130_v35, %s2012_s0 }
 0x3d9   :  { %v337_v59 = vpop.xlane.xlu0 %336 }
 0x3da   :  { %1941 = vrcp.f32 %v337_v59 }
 0x3dd   :  { %v334_v60 = vpop.xlane.xlu0 %333 }
 0x3de   :  { %1943 = vrcp.f32 %v334_v60 }
 0x3e1   :  { %v343_v61 = vpop.permute.xlu0 %342 }
 0x3e2   :  { %1855 = vmatprep.subr.mxu1 %v343_v61  ;;  %1869 = vmatprep.subr.mxu0 %v343_v61 }
 0x3e3   :  { %1856 = vmatpush3.msra.mxu1 %v343_v61  ;;  %1870 = vmatpush3.msra.mxu0 %v343_v61 }
 0x3e4   :  { %1860 = vmatprep.subr.msk.mxu1 %vm235_vm1, %v234_v38  ;;  %1874 = vmatprep.subr.mxu0 %v616_v25 }
 0x3e5   :  { %v433_v5 = vpop.permute.xlu0 %432 }
 0x3e7   :  { %v1942_v62 = vpop.eup %1941 }
 0x3e8   :  { %v341_v3 = vmul.f32 %v1942_v62, %v1938_v55 }
 0x3eb   :  { %v1944_v63 = vpop.eup %1943 }
 0x3ec   :  { %v339_v2 = vmul.f32 %v1944_v63, %v1940_v57 }
 0x3ee   :  { %1857 = vmatprep.mubr.msk.f32.mxu1 %vm319_vm2, %v339_v2 }
 0x3ef   :  { %1858 = vmatmul.mubr.msk.f32.vlgmr.msra.gmra.mxu1 %vm319_vm2, %v341_v3 }
 0x3f0   :  { %1861 = vmatpush3.xpose.msk.msra.mxu1 %vm235_vm1, %v234_v38  ;;  %1864 = vmatprep.mubr.msk.f32.mxu1 %vm235_vm1, %v431_v4 }
 0x3f1   :  { %1862 = vmatprep.subr.msk.mxu1 %vm235_vm1, %v232_v39 }
 0x3f4   :  { %1863 = vmatpush3.xpose.msk.msra.mxu1 %vm235_vm1, %v232_v39 }
 0x3f5   :  { %1879 = vmatprep.subr.mxu1 %v429_v6 }
 0x3f7   :  { %1865 = vmatmul.mubr.msk.f32.vlgmr.msra.gmra.mxu1 %vm235_vm1, %v433_v5 }
 0x3f8   :  { %1880 = vmatpush3.msra.mxu1 %v429_v6 }
 0x4af   :  { %v1859_v7 = vpop.f32.mrf.mxu1 }
 0x4b1   :  { %v420_v8 = vpop.f32.mrf.mxu1 }
 0x4b2   :  { %1881 = vmatprep.mubr.msk.f32.mxu1 %vm235_vm1, %v420_v8 }
 0x4b3   :  { %1882 = vmatmul.mubr.msk.f32.vlgmr.msra.gmra.mxu1 %vm235_vm1, %v1859_v7 }
 0x4b7   :  { %v1866_v9 = vpop.f32.mrf.mxu1 }
 0x4b8   :  { %v510_v10 = vadd.f32 %v1866_v9, %v2147_v40 }
 0x4b9   :  { %v504_v11 = vpop.f32.mrf.mxu1 }
 0x4ba   :  { %v505_v12 = vadd.f32 %v504_v11, %v2152_v42  ;;  %v516_v13 = vsel %vm319_vm2, %v510_v10, -inf }
 0x4bb   :  { %517 = vmax.xlane.f32.xlu1 %v516_v13 }
 0x4bc   :  { %v513_v14 = vsel %vm319_vm2, %v505_v12, -inf }
 0x4bd   :  { %514 = vmax.xlane.f32.xlu0 %v513_v14 }
 0x4cc   :  { %783 = vrot.lane.b32.xlu1 %v2132_v37, %s2014_s18 }
 0x4d0   :  { %781 = vrot.lane.b32.xlu1 %v2130_v35, %s2015_s19 }
 0x4d4   :  { %1065 = vrot.lane.b32.xlu1 %v2130_v35, %s2016_s20 }
 0x544   :  { %v518_v15 = vpop.xlane.xlu1 %517 }
 0x545   :  { %v520_v16 = vsub.f32 %v510_v10, %v518_v15 }
 0x546   :  { %v515_v17 = vpop.xlane.xlu0 %514 }
 0x547   :  { %v519_v18 = vsub.f32 %v505_v12, %v515_v17  ;;  %v523_v19 = vmul.f32 1.442695, %v520_v16 }
 0x548   :  { %v784_v38 = vpop.permute.xlu1 %783 }
 0x549   :  { %v521_v20 = vmul.f32 1.442695, %v519_v18 }
 0x54b   :  { %1945 = vpow2.f32 %v521_v20 }
 0x54c   :  { %1947 = vpow2.f32 %v523_v19  ;;  %v782_v39 = vpop.permute.xlu1 %781 }
 0x550   :  { %v1066_v43 = vpop.permute.xlu1 %1065 }
 0x558   :  { %v1946_v21 = vpop.eup %1945 }
 0x559   :  { %v525_v22 = vsel %vm319_vm2, %v1946_v21, 0.0  ;;  %v1948_v23 = vpop.eup %1947 }
 0x55a   :  { %526 = vadd.xlane.f32.xlu0 %v525_v22  ;;  %v528_v24 = vsel %vm319_vm2, %v1948_v23, 0.0 }
 0x55e   :  { %529 = vadd.xlane.f32.xlu0 %v528_v24 }
 0x573   :  { %v1883_v22 = vpop.f32.mrf.mxu1 }
 0x574   :  { %785 = vrot.lane.b32.xlu0 %v2130_v35, %s2014_s18 }
 0x578   :  { %779 = vrot.lane.b32.xlu0 %v2132_v37, %s2015_s19 }
 0x57c   :  { %1063 = vrot.lane.b32.xlu0 %v2132_v37, %s2016_s20 }
 0x5e3   :  { %v527_v26 = vpop.xlane.xlu0 %526 }
 0x5e4   :  { %1949 = vrcp.f32 %v527_v26 }
 0x5e7   :  { %v530_v27 = vpop.xlane.xlu0 %529 }
 0x5e8   :  { %1951 = vrcp.f32 %v530_v27 }
 0x5eb   :  { %v786_v32 = vpop.permute.xlu0 %785 }
 0x5ef   :  { %v780_v36 = vpop.permute.xlu0 %779 }
 0x5f1   :  { %v1950_v28 = vpop.eup %1949 }
 0x5f2   :  { %v532_v29 = vmul.f32 %v1950_v28, %v1946_v21 }
 0x5f3   :  { %v1064_v41 = vpop.permute.xlu0 %1063 }
 0x5f4   :  { %1871 = vmatprep.mubr.msk.f32.mxu0 %vm319_vm2, %v532_v29 }
 0x5f5   :  { %v1952_v30 = vpop.eup %1951 }
 0x5f6   :  { %v534_v31 = vmul.f32 %v1952_v30, %v1948_v23  ;;  %v770_v23 = vpop.f32.mrf.mxu1 }
 0x5f8   :  { %1872 = vmatmul.mubr.msk.f32.vlgmr.msra.gmra.mxu0 %vm319_vm2, %v534_v31  ;;  %v1249_v31 = vld [vmem:[%s2417_s6 + $0x18] sm:$0xff] }
 0x5f9   :  { %1875 = vmatpush3.msra.mxu0 %v616_v25 }
 0x5fa   :  { %1884 = vmatprep.subr.msk.mxu0 %vm235_vm1, %v786_v32 }
 0x6b8   :  { %v1873_v33 = vpop.f32.mrf.mxu0 }
 0x6ba   :  { %v607_v34 = vpop.f32.mrf.mxu0 }
 0x6bb   :  { %1876 = vmatprep.mubr.msk.f32.mxu0 %vm235_vm1, %v607_v34 }
 0x6bc   :  { %1877 = vmatmul.mubr.msk.f32.vlgmr.msra.gmra.mxu0 %vm235_vm1, %v1873_v33 }
 0x6bd   :  { %1885 = vmatpush3.xpose.msk.msra.mxu0 %vm235_vm1, %v786_v32  ;;  %1888 = vmatprep.mubr.msk.f32.mxu0 %vm235_vm1, %v780_v36 }
 0x6be   :  { %1886 = vmatprep.subr.msk.mxu0 %vm235_vm1, %v784_v38 }
 0x6c1   :  { %1887 = vmatpush3.xpose.msk.msra.mxu0 %vm235_vm1, %v784_v38 }
 0x6c2   :  { %1903 = vmatprep.subr.msk.mxu0 %vm235_vm1, %v786_v32 }
 0x6c4   :  { %1889 = vmatmul.mubr.msk.f32.vlgmr.msra.gmra.mxu0 %vm235_vm1, %v782_v39 }
 0x6c5   :  { %1904 = vmatpush3.xpose.msk.msra.mxu0 %vm235_vm1, %v786_v32  ;;  %1907 = vmatprep.mubr.msk.f32.mxu0 %vm235_vm1, %v1064_v41 }
 0x6c6   :  { %1905 = vmatprep.subr.msk.mxu0 %vm235_vm1, %v784_v38 }
 0x6c9   :  { %1906 = vmatpush3.xpose.msk.msra.mxu0 %vm235_vm1, %v784_v38 }
 0x6cc   :  { %1908 = vmatmul.mubr.msk.f32.vlgmr.msra.gmra.mxu0 %vm235_vm1, %v1066_v43 }
 0x77c   :  { %v2208_v44 = vpop.f32.mrf.mxu0 }
 0x77d   :  { %v776_v32 = vadd.f32 %v1883_v22, %v2208_v44  ;;  %v1570_v22 = vld [vmem:[%s2419_s8 + $0x58] sm:$0xff] }
 0x77e   :  { %v2210_v45 = vpop.f32.mrf.mxu0 }
 0x77f   :  { %v771_v34 = vadd.f32 %v770_v23, %v2210_v45  ;;  %v1585_v23 = vld [vmem:[%s2419_s8 + $0xd0] sm:$0xff] }
 0x784   :  { %v1890_v46 = vpop.f32.mrf.mxu0 }
 0x785   :  { %v867_v47 = vadd.f32 %v1890_v46, %v2147_v40 }
 0x786   :  { %v861_v48 = vpop.f32.mrf.mxu0 }
 0x787   :  { %v862_v49 = vadd.f32 %v861_v48, %v2152_v42  ;;  %v873_v50 = vsel %vm319_vm2, %v867_v47, -inf }
 0x788   :  { %874 = vmax.xlane.f32.xlu1 %v873_v50 }
 0x789   :  { %v870_v51 = vsel %vm319_vm2, %v862_v49, -inf }
 0x78a   :  { %871 = vmax.xlane.f32.xlu0 %v870_v51 }
 0x78c   :  { %v1909_v52 = vpop.f32.mrf.mxu0 }
 0x78d   :  { %v1143_v6 = vadd.f32 %v1909_v52, %v2147_v40 }
 0x78e   :  { %v1137_v53 = vpop.f32.mrf.mxu0 }
 0x78f   :  { %v1138_v54 = vadd.f32 %v1137_v53, %v2152_v42  ;;  %v1149_v7 = vsel %vm319_vm2, %v1143_v6, -inf }
 0x791   :  { %v1146_v55 = vsel %vm319_vm2, %v1138_v54, -inf }
 0x799   :  { %892 = vrot.lane.b32.xlu1 %v2132_v37, %s2017_s22 }
 0x7bd   :  { %1147 = vmax.xlane.f32.xlu1 %v1146_v55  ;;  %v1365_v55 = vld [vmem:[%s2418_s7 + $0x70] sm:$0xff] }
 0x811   :  { %v875_v56 = vpop.xlane.xlu1 %874 }
 0x812   :  { %v877_v57 = vsub.f32 %v867_v47, %v875_v56  ;;  %v1360_v56 = vld [vmem:[%s2418_s7 + $0x48] sm:$0xff] }
 0x813   :  { %v872_v58 = vpop.xlane.xlu0 %871 }
 0x814   :  { %v880_v59 = vmul.f32 1.442695, %v877_v57  ;;  %v876_v60 = vsub.f32 %v862_v49, %v872_v58  ;;  %v1362_v57 = vld [vmem:[%s2418_s7 + $0x58] sm:$0xff]  ;;  %v1359_v58 = vld [vmem:[%s2418_s7 + $0x40] sm:$0xff] }
 0x815   :  { %v893_v42 = vpop.permute.xlu1 %892 }
 0x816   :  { %1953 = vpow2.f32 %v880_v59  ;;  %v878_v61 = vmul.f32 1.442695, %v876_v60  ;;  %v1361_v59 = vld [vmem:[%s2418_s7 + $0x50] sm:$0xff]  ;;  %v1356_v60 = vld [vmem:[%s2418_s7 + $0x28] sm:$0xff] }
 0x818   :  { %1955 = vpow2.f32 %v878_v61  ;;  %v1358_v61 = vld [vmem:[%s2418_s7 + $0x38] sm:$0xff] }
 0x823   :  { %v1954_v62 = vpop.eup %1953 }
 0x824   :  { %v885_v63 = vsel %vm319_vm2, %v1954_v62, 0.0 }
 0x825   :  { %v1956_v2 = vpop.eup %1955  ;;  %886 = vadd.xlane.f32.xlu0 %v885_v63  ;;  %v1357_v63 = vld [vmem:[%s2418_s7 + $0x30] sm:$0xff] }
 0x826   :  { %v882_v37 = vsel %vm319_vm2, %v1956_v2, 0.0 }
 0x829   :  { %883 = vadd.xlane.f32.xlu0 %v882_v37  ;;  %v1354_v37 = vld [vmem:[%s2418_s7 + $0x18] sm:$0xff] }
 0x83f   :  { %894 = vrot.lane.b32.xlu0 %v2130_v35, %s2017_s22  ;;  %v979_v35 = vld [vmem:[%s2417_s6 + $0x10] sm:$0xff] }
 0x846   :  { %v1148_v3 = vpop.xlane.xlu1 %1147 }
 0x847   :  { %v1152_v4 = vsub.f32 %v1138_v54, %v1148_v3  ;;  %v1363_v54 = vld [vmem:[%s2418_s7 + $0x60] sm:$0xff]  ;;  %v1353_v3 = vld [vmem:[%s2418_s7 + $0x10] sm:$0xff] }
 0x849   :  { %v1154_v5 = vmul.f32 1.442695, %v1152_v4  ;;  %v2018_v4 = vmov 0.0  }
 0x84a   :  { %1437 = vmatprep.mubr.f32.mxu0 %v2018_v4 }
 0x84b   :  { %1957 = vpow2.f32 %v1154_v5 }
 0x858   :  { %v1958_v8 = vpop.eup %1957 }
 0x859   :  { %v1158_v9 = vsel %vm319_vm2, %v1958_v8, 0.0 }
 0x85e   :  { %1150 = vmax.xlane.f32.xlu0 %v1149_v7 }
 0x862   :  { %1159 = vadd.xlane.f32.xlu0 %v1158_v9 }
 0x8ae   :  { %v887_v10 = vpop.xlane.xlu0 %886 }
 0x8af   :  { %1959 = vrcp.f32 %v887_v10 }
 0x8b2   :  { %v884_v11 = vpop.xlane.xlu0 %883 }
 0x8b3   :  { %1961 = vrcp.f32 %v884_v11 }
 0x8b6   :  { %v895_v12 = vpop.permute.xlu0 %894 }
 0x8b7   :  { %1891 = vmatprep.subr.mxu1 %v895_v12 }
 0x8b8   :  { %1892 = vmatpush3.msra.mxu1 %v895_v12 }
 0x8b9   :  { %1893 = vmatprep.subr.mxu1 %v893_v42 }
 0x8ba   :  { %1894 = vmatpush3.msra.mxu1 %v893_v42 }
 0x8bb   :  { %1898 = vmatprep.subr.mxu1 %v979_v35 }
 0x8bc   :  { %v1960_v40 = vpop.eup %1959 }
 0x8bd   :  { %v891_v15 = vmul.f32 %v1960_v40, %v1954_v62  ;;  %v1355_v62 = vld [vmem:[%s2418_s7 + $0x20] sm:$0xff] }
 0x8c0   :  { %v1962_v13 = vpop.eup %1961 }
 0x8c1   :  { %v889_v14 = vmul.f32 %v1962_v13, %v1956_v2  ;;  %v1352_v2 = vld [vmem:[%s2418_s7 + $0x8] sm:$0xff]  ;;  %v1590_v13 = vld [vmem:[%s2419_s8 + $0xf8] sm:$0xff] }
 0x8c3   :  { %1895 = vmatprep.mubr.msk.f32.mxu1 %vm319_vm2, %v889_v14  ;;  %v1574_v14 = vld [vmem:[%s2419_s8 + $0x78] sm:$0xff] }
 0x8c4   :  { %1896 = vmatmul.mubr.msk.f32.vlgmr.msra.gmra.mxu1 %vm319_vm2, %v891_v15  ;;  %v1589_v15 = vld [vmem:[%s2419_s8 + $0xf0] sm:$0xff] }
 0x8c5   :  { %1899 = vmatpush3.msra.mxu1 %v979_v35 }
 0x8c6   :  { %1910 = vmatprep.subr.mxu1 %v895_v12 }
 0x8e7   :  { %v1151_v16 = vpop.xlane.xlu0 %1150 }
 0x8e8   :  { %v1153_v17 = vsub.f32 %v1143_v6, %v1151_v16  ;;  %v1573_v16 = vld [vmem:[%s2419_s8 + $0x70] sm:$0xff] }
 0x8ea   :  { %v1156_v18 = vmul.f32 1.442695, %v1153_v17  ;;  %v1588_v17 = vld [vmem:[%s2419_s8 + $0xe8] sm:$0xff] }
 0x8eb   :  { %v1160_v21 = vpop.xlane.xlu0 %1159 }
 0x8ec   :  { %1963 = vpow2.f32 %v1156_v18  ;;  %v1572_v18 = vld [vmem:[%s2419_s8 + $0x68] sm:$0xff] }
 0x8ed   :  { %1965 = vrcp.f32 %v1160_v21  ;;  %v1586_v21 = vld [vmem:[%s2419_s8 + $0xd8] sm:$0xff] }
 0x8f9   :  { %v1964_v19 = vpop.eup %1963 }
 0x8fa   :  { %v1161_v20 = vsel %vm319_vm2, %v1964_v19, 0.0  ;;  %v1966_v24 = vpop.eup %1965 }
 0x8fb   :  { %1162 = vadd.xlane.f32.xlu1 %v1161_v20  ;;  %v1165_v28 = vmul.f32 %v1966_v24, %v1958_v8  ;;  %v1571_v20 = vld [vmem:[%s2419_s8 + $0x60] sm:$0xff]  ;;  %v1569_v24 = vld [vmem:[%s2419_s8 + $0x50] sm:$0xff] }
 0x984   :  { %v1897_v25 = vpop.f32.mrf.mxu1  ;;  %v1163_v26 = vpop.xlane.xlu1 %1162 }
 0x985   :  { %1967 = vrcp.f32 %v1163_v26  ;;  %v1568_v26 = vld [vmem:[%s2419_s8 + $0x48] sm:$0xff] }
 0x986   :  { %v970_v27 = vpop.f32.mrf.mxu1 }
 0x987   :  { %1900 = vmatprep.mubr.msk.f32.mxu1 %vm235_vm1, %v970_v27  ;;  %v1583_v27 = vld [vmem:[%s2419_s8 + $0xc0] sm:$0xff] }
 0x988   :  { %1901 = vmatmul.mubr.msk.f32.vlgmr.msra.gmra.mxu1 %vm235_vm1, %v1897_v25  ;;  %v1584_v25 = vld [vmem:[%s2419_s8 + $0xc8] sm:$0xff] }
 0x989   :  { %1911 = vmatpush3.msra.mxu1 %v895_v12  ;;  %1914 = vmatprep.mubr.msk.f32.mxu1 %vm319_vm2, %v1165_v28  ;;  %v1567_v28 = vld [vmem:[%s2419_s8 + $0x40] sm:$0xff] }
 0x98a   :  { %1912 = vmatprep.subr.mxu1 %v893_v42 }
 0x98b   :  { %1913 = vmatpush3.msra.mxu1 %v893_v42  ;;  %v1351_v42 = vld [vmem:[%s2418_s7] sm:$0xff] }
 0x98c   :  { %1917 = vmatprep.subr.mxu1 %v1249_v31 }
 0x992   :  { %v1968_v29 = vpop.eup %1967 }
 0x993   :  { %v1167_v30 = vmul.f32 %v1968_v29, %v1964_v19  ;;  %v1587_v19 = vld [vmem:[%s2419_s8 + $0xe0] sm:$0xff]  ;;  %v1582_v29 = vld [vmem:[%s2419_s8 + $0xb8] sm:$0xff] }
 0x995   :  { %1915 = vmatmul.mubr.msk.f32.vlgmr.msra.gmra.mxu1 %vm319_vm2, %v1167_v30  ;;  %v1566_v30 = vld [vmem:[%s2419_s8 + $0x38] sm:$0xff] }
 0x996   :  { %1918 = vmatpush3.msra.mxu1 %v1249_v31  ;;  %v1581_v31 = vld [vmem:[%s2419_s8 + $0xb0] sm:$0xff] }
 0xa48   :  { %v1902_v33 = vpop.f32.mrf.mxu1 }
 0xa49   :  { %v1062_v36 = vadd.f32 %v1902_v33, %v776_v32  ;;  %v1565_v32 = vld [vmem:[%s2419_s8 + $0x30] sm:$0xff]  ;;  %v1580_v33 = vld [vmem:[%s2419_s8 + $0xa8] sm:$0xff] }
 0xa4a   :  { %v1052_v38 = vpop.f32.mrf.mxu1 }
 0xa4b   :  { %v1061_v39 = vadd.f32 %v1052_v38, %v771_v34  ;;  %v1564_v34 = vld [vmem:[%s2419_s8 + $0x28] sm:$0xff]  ;;  %v1563_v38 = vld [vmem:[%s2419_s8 + $0x20] sm:$0xff] }
 0xa55   :  { %v1916_v41 = vpop.f32.mrf.mxu1 }
 0xa57   :  { %v1240_v43 = vpop.f32.mrf.mxu1 }
 0xa58   :  { %1919 = vmatprep.mubr.msk.f32.mxu1 %vm235_vm1, %v1240_v43  ;;  %v1577_v43 = vld [vmem:[%s2419_s8 + $0x90] sm:$0xff] }
 0xa59   :  { %1920 = vmatmul.mubr.msk.f32.vlgmr.msra.gmra.mxu1 %vm235_vm1, %v1916_v41  ;;  %v1562_v41 = vld [vmem:[%s2419_s8 + $0x18] sm:$0xff] }
 0xa5a   :  { %1514 = vmatprep.mubr.f32.mxu1 %v2018_v4 }
 0xb19   :  { %v1921_v46 = vpop.f32.mrf.mxu1 }
 0xb1a   :  { %v1332_v47 = vadd.f32 %v1921_v46, %v1062_v36  ;;  %v1579_v36 = vld [vmem:[%s2419_s8 + $0xa0] sm:$0xff]  ;;  %v1561_v46 = vld [vmem:[%s2419_s8 + $0x10] sm:$0xff] }
 0xb1b   :  { %v1322_v48 = vpop.f32.mrf.mxu1 }
 0xb1c   :  { %v2243_v49 = vadd.f32 %v1332_v47, %v2080_v1  ;;  %v1331_v50 = vadd.f32 %v1322_v48, %v1061_v39  ;;  %v1364_v1 = vld [vmem:[%s2418_s7 + $0x68] sm:$0xff]  ;;  %v1578_v39 = vld [vmem:[%s2419_s8 + $0x98] sm:$0xff] }
 0xb1d   :  { %1397 = vmatprep.subr.mxu0 %v1364_v1  ;;  %v1576_v47 = vld [vmem:[%s2419_s8 + $0x88] sm:$0xff] }
 0xb1e   :  { %v2246_v44 = vadd.f32 %v1331_v50, %v2075_v0  ;;  %v1336_v45 = vmul.f32 %v2243_v49, %v2243_v49  ;;  %v1366_v0 = vld [vmem:[%s2418_s7 + $0x78] sm:$0xff]  ;;  %1398 = vmatpush1.msra.mxu0 %v1363_v54  ;;  %v1560_v48 = vld [vmem:[%s2419_s8 + $0x8] sm:$0xff]  ;;  %v1575_v50 = vld [vmem:[%s2419_s8 + $0x80] sm:$0xff] }
 0xb1f   :  { %1474 = vmatprep.subr.mxu1 %v1366_v0  ;;  %1399 = vmatprep.subr.mxu0 %v1360_v56 }
 0xb20   :  { %v1340_v51 = vsel %vm37_vm0, %v1336_v45, 0.0  ;;  %v1335_v52 = vmul.f32 %v2246_v44, %v2246_v44  ;;  %1475 = vmatpush1.msra.mxu1 %v1365_v55  ;;  %1400 = vmatpush1.msra.mxu0 %v1359_v58  ;;  %v1559_v45 = vld [vmem:[%s2419_s8] sm:$0xff]  ;;  %s2019_s8 = smov [#allocation2]  }
 0xb21   :  { %1341 = vadd.xlane.f32.xlu1 %v1340_v51  ;;  %1476 = vmatprep.subr.mxu1 %v1362_v57  ;;  %s1675_s13 = sshll.u32 %s2019_s8, 4  ;;  %s1676_s13 = int_to_ptr.vmem [resolvable:$true] %s1675_s13 }
 0xb22   :  { %v1337_v53 = vsel %vm37_vm0, %v1335_v52, 0.0  ;;  %1477 = vmatpush1.msra.mxu1 %v1361_v59  ;;  %1401 = vmatprep.subr.mxu0 %v1356_v60  ;;  %s1989_s3 = scalar_lea.vmem %s1676_s13, 256  ;;  %p1994_p1 = scmp.lt.s32.totalorder %s1676_s13, %s1676_s13 }
 0xb23   :  { %1338 = vadd.xlane.f32.xlu0 %v1337_v53  ;;  %1478 = vmatprep.subr.mxu1 %v1358_v61  ;;  %p1990_p0 = scmp.ne.s32.totalorder %s1676_s13, %s1989_s3  ;;  %p1995_p2 = scmp.lt.s32.totalorder %s1989_s3, %s1989_s3 }
 0xb24   :  { %1402 = vmatpush1.msra.mxu0 %v1355_v62  ;;  %1479 = vmatpush1.msra.mxu1 %v1357_v63 }
 0xb25   :  { %1403 = vmatprep.subr.mxu0 %v1352_v2  ;;  %1480 = vmatprep.subr.mxu1 %v1354_v37  ;;  %p1996_p3 = por %p1995_p2, %p1994_p1 }
 0xb26   :  { %1404 = vmatpush1.msra.mxu0 %v1351_v42  ;;  %1481 = vmatpush1.msra.mxu1 %v1353_v3 }
 0xb27   :  { %1786 = vmatprep.subr.mxu0 %v1590_v13  ;;  %p1997_p4 = pnand %p1996_p3, %p1990_p0 }
 0xbaa   :  { %v1342_v5 = vpop.xlane.xlu1 %1341 }
 0xbab   :  { %v1344_v6 = vmul.f32 0.03125, %v1342_v5 }
 0xbac   :  { %v1339_v7 = vpop.xlane.xlu0 %1338 }
 0xbad   :  { %v1343_v8 = vmul.f32 0.03125, %v1339_v7  ;;  %v1346_v9 = vadd.f32 1e-05, %v1344_v6 }
 0xbaf   :  { %v1345_v10 = vadd.f32 1e-05, %v1343_v8 }
 0xbb1   :  { %1969 = vrsqrt.f32 %v1345_v10 }
 0xbb2   :  { %1971 = vrsqrt.f32 %v1346_v9 }
 0xbbe   :  { %v1970_v11 = vpop.eup %1969 }
 0xbbf   :  { %v1349_v12 = vmul.f32 %v1970_v11, %v2246_v44  ;;  %v1972_v35 = vpop.eup %1971 }
 0xbc0   :  { %v1350_v40 = vmul.f32 %v1972_v35, %v2243_v49 }
 0xbc1   :  { %1722 = vmatmul.mubr.msk.f32.vlgmr.msra.gmra.mxu0 %vm37_vm0, %v1349_v12  ;;  %1724 = vmatmul.mubr.msk.f32.vlgmr.msra.gmra.mxu1 %vm37_vm0, %v1349_v12 }
 0xbc2   :  { %1443 = vmatprep.mubr.f32.mxu0 %v2018_v4  ;;  %1520 = vmatprep.mubr.f32.mxu1 %v2018_v4 }
 0xbc3   :  { %1787 = vmatpush3.msra.mxu0 %v1574_v14 }
 0xbc4   :  { %1788 = vmatprep.subr.mxu0 %v1589_v15 }
 0xbc5   :  { %1723 = vmatmul.mubr.msk.f32.gmra.mxu0 %vm37_vm0, %v1350_v40  ;;  %1725 = vmatmul.mubr.msk.f32.gmra.mxu1 %vm37_vm0, %v1350_v40 }
 0xbc6   :  { %1789 = vmatpush3.msra.mxu0 %v1573_v16 }
 0xbc7   :  { %1790 = vmatprep.subr.mxu0 %v1588_v17 }
 0xbc8   :  { %1791 = vmatpush3.msra.mxu0 %v1572_v18 }
 0xbc9   :  { %1792 = vmatprep.subr.mxu0 %v1587_v19 }
 0xbca   :  { %1793 = vmatpush3.msra.mxu0 %v1571_v20 }
 0xbcb   :  { %1794 = vmatprep.subr.mxu0 %v1586_v21 }
 0xbcc   :  { %1795 = vmatpush3.msra.mxu0 %v1570_v22 }
 0xbcd   :  { %1796 = vmatprep.subr.mxu0 %v1585_v23 }
 0xbce   :  { %1797 = vmatpush3.msra.mxu0 %v1569_v24 }
 0xbcf   :  { %1798 = vmatprep.subr.mxu0 %v1584_v25 }
 0xbd0   :  { %1799 = vmatpush3.msra.mxu0 %v1568_v26 }
 0xbd1   :  { %1800 = vmatprep.subr.mxu0 %v1583_v27 }
 0xbd2   :  { %1801 = vmatpush3.msra.mxu0 %v1567_v28 }
 0xbd3   :  { %1802 = vmatprep.subr.mxu0 %v1582_v29 }
 0xbd4   :  { %1803 = vmatpush3.msra.mxu0 %v1566_v30 }
 0xbd5   :  { %1804 = vmatprep.subr.mxu0 %v1581_v31 }
 0xbd6   :  { %1805 = vmatpush3.msra.mxu0 %v1565_v32 }
 0xbd7   :  { %1806 = vmatprep.subr.mxu0 %v1580_v33 }
 0xbd8   :  { %1807 = vmatpush3.msra.mxu0 %v1564_v34 }
 0xbd9   :  { %1808 = vmatprep.subr.mxu0 %v1579_v36 }
 0xbda   :  { %1809 = vmatpush3.msra.mxu0 %v1563_v38 }
 0xbdb   :  { %1810 = vmatprep.subr.mxu0 %v1578_v39 }
 0xbdc   :  { %1811 = vmatpush3.msra.mxu0 %v1562_v41 }
 0xbdd   :  { %1812 = vmatprep.subr.mxu0 %v1577_v43 }
 0xbde   :  { %1813 = vmatpush3.msra.mxu0 %v1561_v46 }
 0xbdf   :  { %1814 = vmatprep.subr.mxu0 %v1576_v47 }
 0xbe0   :  { %1815 = vmatpush3.msra.mxu0 %v1560_v48 }
 0xbe1   :  { %1816 = vmatprep.subr.mxu0 %v1575_v50 }
 0xbe2   :  { %1817 = vmatpush3.msra.mxu0 %v1559_v45 }
 0xc81   :  { %v1439_v51 = vpop.f32.mrf.mxu0  ;;  %v1516_v37 = vpop.f32.mrf.mxu1 }
 0xc82   :  { %v1726_v52 = vmul.f32 -1.442695, %v1439_v51 }
 0xc83   :  { %v1441_v53 = vpop.f32.mrf.mxu0  ;;  %v1518_v3 = vpop.f32.mrf.mxu1 }
 0xc84   :  { %1973 = vpow2.f32 %v1726_v52  ;;  %v1727_v1 = vmul.f32 -1.442695, %v1441_v53 }
 0xc85   :  { %v1445_v0 = vpop.f32.mrf.mxu0  ;;  %v1522_v8 = vpop.f32.mrf.mxu1 }
 0xc86   :  { %1975 = vpow2.f32 %v1727_v1  ;;  %v1728_v54 = vmul.f32 -1.442695, %v1445_v0 }
 0xc87   :  { %v1447_v55 = vpop.f32.mrf.mxu0  ;;  %v1524_v40 = vpop.f32.mrf.mxu1 }
 0xc88   :  { %1977 = vpow2.f32 %v1728_v54  ;;  %v1729_v56 = vmul.f32 -1.442695, %v1447_v55 }
 0xc8a   :  { %1979 = vpow2.f32 %v1729_v56 }
 0xc91   :  { %v1974_v57 = vpop.eup %1973 }
 0xc92   :  { %v1539_v58 = vadd.f32 1.0, %v1974_v57 }
 0xc93   :  { %v1976_v59 = vpop.eup %1975 }
 0xc94   :  { %1981 = vrcp.f32 %v1539_v58  ;;  %v1540_v60 = vadd.f32 1.0, %v1976_v59 }
 0xc95   :  { %v1978_v61 = vpop.eup %1977 }
 0xc96   :  { %1983 = vrcp.f32 %v1540_v60  ;;  %v1541_v62 = vadd.f32 1.0, %v1978_v61 }
 0xc97   :  { %v1980_v63 = vpop.eup %1979 }
 0xc98   :  { %1985 = vrcp.f32 %v1541_v62  ;;  %v1542_v2 = vadd.f32 1.0, %v1980_v63 }
 0xc9a   :  { %1987 = vrcp.f32 %v1542_v2 }
 0xca1   :  { %v1982_v42 = vpop.eup %1981 }
 0xca2   :  { %v1551_v5 = vmul.f32 %v1982_v42, %v1439_v51 }
 0xca3   :  { %v1984_v4 = vpop.eup %1983 }
 0xca4   :  { %v1552_v6 = vmul.f32 %v1984_v4, %v1441_v53  ;;  %v1555_v11 = vmul.f32 %v1551_v5, %v1516_v37 }
 0xca5   :  { %v1986_v7 = vpop.eup %1985 }
 0xca6   :  { %v1556_v9 = vmul.f32 %v1552_v6, %v1518_v3  ;;  %v1553_v12 = vmul.f32 %v1986_v7, %v1445_v0 }
 0xca7   :  { %v1988_v10 = vpop.eup %1987 }
 0xca8   :  { %v1554_v35 = vmul.f32 %v1988_v10, %v1447_v55  ;;  %1655 = vmatprep.mubr.f32.mxu0 %v1556_v9  ;;  %v1557_v14 = vmul.f32 %v1553_v12, %v1522_v8 }
 0xca9   :  { %1656 = vmatmul.mubr.f32.vlgmr.msra.gmra.mxu0 %v1555_v11 }
 0xcaa   :  { %v1558_v13 = vmul.f32 %v1554_v35, %v1524_v40 }
 0xcac   :  { %1660 = vmatprep.mubr.f32.mxu0 %v1558_v13 }
 0xcad   :  { %1661 = vmatmul.mubr.f32.gmra.mxu0 %v1557_v14 }
 0xd69   :  { %v1818_v15 = vpop.f32.mrf.mxu0 }
 0xd6b   :  { %v1819_v16 = vpop.f32.mrf.mxu0 }
 0xd6c   :  { %v1820_v17 = vadd.f32 %v1819_v16, %v1818_v15 }
 0xd6d   :  { %v1821_v18 = vpop.f32.mrf.mxu0 }
 0xd6e   :  { %v1666_v19 = vadd.f32 %v1820_v17, %v2246_v44 }
 0xd6f   :  { %v1822_v20 = vpop.f32.mrf.mxu0 }
 0xd70   :  { %1668 = vst.msk [vmem:[#allocation2] sm:$0xff] %vm37_vm0, %v1666_v19  ;;  %v1823_v21 = vadd.f32 %v1822_v20, %v1821_v18 }
 0xd72   :  { %v1667_v22 = vadd.f32 %v1823_v21, %v2243_v49 }
 0xd74   :  { %1669 = vst.msk [vmem:[#allocation2 + $0x8] sm:$0xff] %vm37_vm0, %v1667_v22 }
 0xd75   :  { %2000 = shalt.err (!%p1997_p4)
}
 0xd76   :  { %s2020_s4 = smov 128   ;;  %s2021_s14 = smov 8  }
 0xd77   :  { %1681 = dma.vmem_to_hbm [thread:$0]  %s1676_s13, 256, %s2420_s9, [#allocation3], %s2020_s4, %s2020_s4, %s2021_s14  }
 0xd78   :  { %2009 = dma.done.wait [#allocation3], 256  }
 0xd79   :  { %2010 = vsyncadd [#allocation3], 4294967040 }
 0xd7a   :  { %1685 = vsyncpa [#allocation3], 1 }

</bundles_post_ra>
